<compile_context>
chip_gen: v5e
topology: v5e:2x2
jax: 0.10.0
libtpu: 0.0.40
codegen_flags: <defaults>
</compile_context>

<pallas_src>
import jax
import jax.numpy as jnp
from jax.experimental import pallas as pl
from jax.experimental.pallas import tpu as pltpu


def _uncertainty_loss_kernel(losses_ref, sigma_ref, out_ref):
    # losses_ref, sigma_ref: (1, v_num) in VMEM.  out_ref: (1, 1) f32 in SMEM.
    losses = losses_ref[...].astype(jnp.float32)   # in-kernel widen (no-op for f32)
    sigma = sigma_ref[...].astype(jnp.float32)

    # Single additive lane reduce:
    #   sum_i [ loss_i / (2 * sigma_i^2) + log(sigma_i) ]
    # == sum_i loss_i / (2 * sigma_i^2) + log(prod_i sigma_i)
    per_lane = losses / (2.0 * sigma * sigma) + jnp.log(sigma)   # (1, v_num)
    total = jnp.sum(per_lane, keepdims=True)                     # (1, 1)
    out_ref[0, 0] = total[0, 0]


def _uncertainty_loss_fwd_pallas(losses, sigma):
    """losses: (v_num,) task losses, sigma: (v_num,) parameter -> scalar f32."""
    v_num = losses.shape[0]
    assert sigma.shape == (v_num,)

    # Metadata-only reshapes; no concat/stack HLO, no wrapper-side cast.
    losses2d = losses.reshape(1, v_num)
    sigma2d = sigma.reshape(1, v_num)

    bytes_in = (losses2d.size * losses2d.dtype.itemsize
                + sigma2d.size * sigma2d.dtype.itemsize)

    out = pl.pallas_call(
        _uncertainty_loss_kernel,
        out_shape=jax.ShapeDtypeStruct((1, 1), jnp.float32),
        in_specs=[
            pl.BlockSpec(memory_space=pltpu.VMEM),
            pl.BlockSpec(memory_space=pltpu.VMEM),
        ],
        out_specs=pl.BlockSpec(memory_space=pltpu.SMEM),
        cost_estimate=pl.CostEstimate(
            flops=4 * v_num,
            transcendentals=v_num,
            bytes_accessed=bytes_in + 4,
        ),
    )(losses2d, sigma2d)
    return out[0, 0]


@jax.custom_vjp
def uncertainty_loss(losses, sigma):
    return _uncertainty_loss_fwd_pallas(losses, sigma)


def _uncertainty_loss_fwd(losses, sigma):
    return _uncertainty_loss_fwd_pallas(losses, sigma), (losses, sigma)


def _uncertainty_loss_bwd(residuals, g):
    # Closed-form gradients (no backward kernel needed):
    #   d/dloss_i  =  1 / (2 * sigma_i^2)
    #   d/dsigma_i = -loss_i / sigma_i^3 + 1 / sigma_i
    losses, sigma = residuals
    losses_f = losses.astype(jnp.float32)
    sigma_f = sigma.astype(jnp.float32)
    d_losses = g / (2.0 * sigma_f * sigma_f)
    d_sigma = g * (-losses_f / (sigma_f * sigma_f * sigma_f) + 1.0 / sigma_f)
    return d_losses.astype(losses.dtype), d_sigma.astype(sigma.dtype)


uncertainty_loss.defvjp(_uncertainty_loss_fwd, _uncertainty_loss_bwd)


if __name__ == "__main__":
    v_num = 4

    key = jax.random.PRNGKey(0)
    k1, k2 = jax.random.split(key)

    # v_num scalar task losses.
    losses = jax.random.uniform(
        k1, (v_num,), dtype=jnp.float32, minval=0.1, maxval=2.0
    )
    # Parameter init is ones (nn.Parameter(torch.ones(v_num))); perturb slightly
    # so the log(sigma) term is actually exercised in the check.
    sigma = jnp.ones((v_num,), jnp.float32) + 0.1 * jax.random.uniform(
        k2, (v_num,), dtype=jnp.float32
    )

    result = jax.block_until_ready(uncertainty_loss(losses, sigma))

    # Pure-JAX reference in the original torch formulation (prod-then-log).
    ref = jnp.sum(losses / (2.0 * sigma ** 2)) + jnp.log(jnp.prod(sigma))
    assert jnp.allclose(result, ref, rtol=1e-5, atol=1e-5), (result, ref)

    # Check the closed-form custom_vjp against autodiff of the reference.
    ref_fn = lambda l, s: jnp.sum(l / (2.0 * s ** 2)) + jnp.log(jnp.prod(s))
    g_losses, g_sigma = jax.grad(uncertainty_loss, argnums=(0, 1))(losses, sigma)
    rg_losses, rg_sigma = jax.grad(ref_fn, argnums=(0, 1))(losses, sigma)
    assert jnp.allclose(g_losses, rg_losses, rtol=1e-5, atol=1e-5), (g_losses, rg_losses)
    assert jnp.allclose(g_sigma, rg_sigma, rtol=1e-5, atol=1e-5), (g_sigma, rg_sigma)

    print("KERNEL_OK")
</pallas_src>

<mosaic_0001>
module attributes {stable_mosaic.version = 11 : i64} {
  func.func @_uncertainty_loss_kernel(%arg0: memref<1x4xf32, #tpu.memory_space<vmem>>, %arg1: memref<1x4xf32, #tpu.memory_space<vmem>>, %arg2: memref<1x1xf32, #tpu.memory_space<smem>>) attributes {dimension_semantics = [], scalar_prefetch = 0 : i64, scratch_operands = 0 : i64, tpu.core_type = #tpu.core_type<tc>} {
    %c0 = arith.constant 0 : index
    %c0_0 = arith.constant 0 : index
    %0 = vector.load %arg0[%c0, %c0_0] : memref<1x4xf32, #tpu.memory_space<vmem>>, vector<1x4xf32>
    %c0_1 = arith.constant 0 : index
    %c0_2 = arith.constant 0 : index
    %1 = vector.load %arg1[%c0_1, %c0_2] : memref<1x4xf32, #tpu.memory_space<vmem>>, vector<1x4xf32>
    %cst = arith.constant 2.000000e+00 : f32
    %2 = vector.broadcast %cst : f32 to vector<1x4xf32>
    %3 = arith.mulf %2, %1 : vector<1x4xf32>
    %4 = arith.mulf %3, %1 : vector<1x4xf32>
    %5 = arith.divf %0, %4 : vector<1x4xf32>
    %6 = math.log %1 : vector<1x4xf32>
    %7 = arith.addf %5, %6 : vector<1x4xf32>
    %8 = vector.shape_cast %7 : vector<1x4xf32> to vector<1x1x4xf32>
    %cst_3 = arith.constant dense<0.000000e+00> : vector<1xf32>
    %9 = vector.multi_reduction <add>, %8, %cst_3 [1, 2] : vector<1x1x4xf32> to vector<1xf32>
    %10 = vector.shape_cast %9 : vector<1xf32> to vector<1x1x1xf32>
    %11 = vector.extract %10[0, 0, 0] : f32 from vector<1x1x1xf32>
    %12 = vector.broadcast %11 : f32 to vector<1x1xf32>
    %13 = vector.extract %12[0, 0] : f32 from vector<1x1xf32>
    %c0_4 = arith.constant 0 : index
    %c0_5 = arith.constant 0 : index
    %14 = memref.load %arg2[%c0_4, %c0_5] : memref<1x1xf32, #tpu.memory_space<smem>>
    memref.store %13, %arg2[%c0_4, %c0_5] : memref<1x1xf32, #tpu.memory_space<smem>>
    return
  }
}

</mosaic_0001>

<bundles_post_ra>
// kernel: tpu_custom_call.1
= control target key start
LH: loop header
LB: loop body
LE: loop exit
PB: predicated region body
PF: predicated region fallthrough
CT: control target
= control target key end

     0   :  { %7 = vsyncpa [#allocation3], 0  ;;  %s194_s0 = inlined_call_operand.hbm [shape: f32[1,4], index: 0, kind: input, shape index: {}]   ;;  %s195_s1 = inlined_call_operand.hbm [shape: f32[1,4], index: 1, kind: input, shape index: {}]   ;;  %s196_s2 = inlined_call_operand.hbm [shape: f32[1,1], index: 2, kind: output, shape index: {}]  }
   0x1   :  { %8 = vsyncpa [#allocation6], 0 }
   0x2   :  { %9 = vsyncpa [#allocation4], 0  ;;  %s15_s11 = sshll.u32 %s194_s0, 4  ;;  %s167_s12 = smov [#allocation2]   ;;  %s16_s11 = int_to_ptr.hbm [resolvable:$true] %s15_s11 }
   0x3   :  { %s17_s13 = sshll.u32 %s167_s12, 4  ;;  %s26_s16 = sshll.u32 %s195_s1, 4  ;;  %s18_s13 = int_to_ptr.vmem [resolvable:$true] %s17_s13  ;;  %s27_s16 = int_to_ptr.hbm [resolvable:$true] %s26_s16 }
   0x4   :  { %20 = dma.hbm_to_vmem [thread:$0]  %s16_s11, 16, %s18_s13, [#allocation3]  }
   0x5   :  { %s168_s17 = smov [#allocation5]  }
   0x6   :  { %s28_s18 = sshll.u32 %s168_s17, 4  ;;  %s29_s18 = int_to_ptr.vmem [resolvable:$true] %s28_s18 }
   0x7   :  { %31 = dma.hbm_to_vmem [thread:$0]  %s27_s16, 16, %s29_s18, [#allocation6]  }
   0x8   :  { %161 = dma.done.wait [#allocation3], 16  }
   0x9   :  { %162 = vsyncadd [#allocation3], 4294967280 }
   0xa   :  { %163 = dma.done.wait [#allocation6], 16  }
   0xb   :  { %164 = vsyncadd [#allocation6], 4294967280  ;;  %v41_v0 = vld [vmem:[#allocation5] sm:$0x1]  ;;  %v40_v12 = vld [vmem:[#allocation2] sm:$0x1] }
   0xc   :  { %v42_v1 = vmul.f32 2.0, %v41_v0  ;;  %vm62_vm4 = vcmask 24576   ;;  %s80_s19 = sshll.u32 %s196_s2, 4  ;;  %s169_s21 = smov [#allocation7]   ;;  %s81_s19 = int_to_ptr.hbm [resolvable:$true] %s80_s19 }
   0xe   :  { %v43_v2 = vmul.f32 %v42_v1, %v41_v0 }
  0x10   :  { %97 = vrcp.f32 %v43_v2  ;;  %v55_v5 = vand.u32 2147483648, %v43_v2  ;;  %vm49_vm0 = vweird.f32 %v43_v2  ;;  %v53_v7 = vand.u32 2147483647, %v43_v2 }
  0x11   :  { %99 = vlog2.f32 %v41_v0 }
  0x12   :  { %v56_v10 = vor.u32 1.1754944e-38, %v55_v5  ;;  %vm54_vm3 = vcmp.eq.f32.partialorder %v53_v7, 8.507059e+37 }
  0x16   :  { %v98_v3 = vpop.eup %97 }
  0x17   :  { %v45_v4 = vmul.f32 %v98_v3, %v43_v2  ;;  %vm50_vm1 = vweird.f32 %v98_v3  ;;  %v100_v9 = vpop.eup %99 }
  0x18   :  { %vm51_vm2 = vmor %vm49_vm0, %vm50_vm1  ;;  %v60_v14 = vmul.f32 0.6931472, %v100_v9 }
  0x19   :  { %v46_v6 = vsub.f32 1.0, %v45_v4 }
  0x1b   :  { %v47_v8 = vmul.f32 %v98_v3, %v46_v6 }
  0x1d   :  { %v48_v11 = vadd.f32 %v98_v3, %v47_v8 }
  0x1f   :  { %v52_v13 = vsel %vm51_vm2, %v98_v3, %v48_v11 }
  0x20   :  { %v57_v15 = vsel %vm54_vm3, %v56_v10, %v52_v13 }
  0x21   :  { %v58_v16 = vmul.f32 %v57_v15, %v40_v12 }
  0x23   :  { %v61_v17 = vadd.f32 %v60_v14, %v58_v16 }
  0x25   :  { %v63_v18 = vsel %vm62_vm4, %v61_v17, 0.0 }
  0x26   :  { %64 = vadd.xlane.f32.xlu0 %v63_v18 }
  0x99   :  { %v65_v19 = vpop.xlane.xlu0 %64 }
  0x9a   :  { %v66_v20 = vrot.slane %v65_v19, 4 }
  0x9c   :  { %v67_v21 = vadd.f32 %v66_v20, %v65_v19 }
  0x9e   :  { %v68_v22 = vrot.slane %v67_v21, 2 }
  0xa0   :  { %v69_v23 = vadd.f32 %v68_v22, %v67_v21 }
  0xa2   :  { %v70_v24 = vrot.slane %v69_v23, 1 }
  0xa4   :  { %v71_v25 = vadd.f32 %v70_v24, %v69_v23 }
  0xa6   :  { %92 = vpush %v71_v25 }
  0xd7   :  { %s93_s20 = spop %92 }
  0xd8   :  { %74 = sst [smem:[#allocation7]] %s93_s20 }
  0xd9   :  { %83 = dma.smem_to_hbm %s169_s21, 16, %s81_s19, [#allocation4]  }
  0xda   :  { %165 = dma.done.wait [#allocation4], 16  }
  0xdb   :  { %166 = vsyncadd [#allocation4], 4294967280 }
  0xdc   :  { %88 = sfence }
  0xdd   :  { %89 = vsyncpa [#allocation3], 1 }
  0xde   :  { %90 = vsyncpa [#allocation6], 1 }
  0xdf   :  { %91 = vsyncpa [#allocation4], 1 }

</bundles_post_ra>
